<compile_context>
chip_gen: v6e
topology: v6e:2x2x1
jax: 0.10.0
libtpu: 0.0.40
codegen_flags: <defaults>
</compile_context>

<pallas_src>
import functools

import jax
import jax.numpy as jnp
import numpy as np
from jax.experimental import pallas as pl
from jax.experimental.pallas import tpu as pltpu


def _round_up(x, m):
    return ((x + m - 1) // m) * m


def _choose_time_tile(T):
    for tt in (512, 256, 128, 64, 32, 16, 8):
        if T % tt == 0:
            return tt
    return T


# ---------------------------------------------------------------------------
# Kernel 1: input 1x1 conv (D -> Fp), tiled over time so the (tT, D) x-block
# stays small even at production D/T.
# ---------------------------------------------------------------------------
def _inproj_kernel(x_ref, w_ref, b_ref, o_ref):
    x = x_ref[0].astype(jnp.bfloat16)                       # (tT, D)
    o_ref[0] = (jnp.dot(x, w_ref[...], preferred_element_type=jnp.float32)
                + b_ref[...]).astype(o_ref.dtype)


# ---------------------------------------------------------------------------
# Kernel 2: dilated residual stack + output 1x1 conv, one batch element per
# grid step.
# ---------------------------------------------------------------------------
def _stack_kernel(num_layers, pad_lo, a_ref, m_ref, wd_ref, bd_ref,
                  w1_ref, b1_ref, w_out_ref, b_out_ref, o_ref, pad_ref):
    T = a_ref.shape[1]
    out = a_ref[0]                                          # (T, Fp) f32 residual

    # Zero the padded scratch once; halo rows are never written afterwards, so
    # they provide the dilated-conv zero padding for every layer.
    pad_ref[...] = jnp.zeros_like(pad_ref)

    for l in range(num_layers):                             # static unroll
        d = 2 ** l
        # Current activation into the centre of the padded scratch.
        pad_ref[pad_lo:pad_lo + T, :] = out
        prev = pad_ref[pad_lo - d:pad_lo - d + T, :]        # out[t - d], zero padded
        cur = pad_ref[pad_lo:pad_lo + T, :]                 # out[t]
        nxt = pad_ref[pad_lo + d:pad_lo + d + T, :]         # out[t + d], zero padded
        # Fused 3-tap dilated conv: one (T, 3Fp) @ (3Fp, Fp) bf16 matmul.
        cat = jnp.concatenate([prev, cur, nxt], axis=-1).astype(jnp.bfloat16)
        h = jnp.dot(cat, wd_ref[l], preferred_element_type=jnp.float32) + bd_ref[l]
        h = jnp.maximum(h, 0.0)                             # ReLU
        h = jnp.dot(h.astype(jnp.bfloat16), w1_ref[l],
                    preferred_element_type=jnp.float32) + b1_ref[l]
        # TODO(synk): nn.Dropout is identity at inference; training-mode dropout not implemented.
        out = out + h                                       # residual

    # conv_out (Fp -> Cp, lane-dense), then multiply by mask[:, 0:1, :]
    y = jnp.dot(out.astype(jnp.bfloat16), w_out_ref[...],
                preferred_element_type=jnp.float32) + b_out_ref[...]
    o_ref[0] = (y * m_ref[0]).astype(o_ref.dtype)


# ---------------------------------------------------------------------------
# Parameter preparation: PyTorch-layout weights -> padded, channels-last,
# bf16 kernel layout (padding lanes carry exact zeros end-to-end).
# ---------------------------------------------------------------------------
def _prepare_params(p, num_layers):
    F, D = p['w_in_pt'].shape
    C = p['w_out_pt'].shape[0]
    Fp = _round_up(F, 128)
    Cp = _round_up(C, 128)

    w_in = jnp.pad(p['w_in_pt'].T, ((0, 0), (0, Fp - F))).astype(jnp.bfloat16)
    b_in = jnp.pad(p['b_in_pt'], (0, Fp - F)).reshape(1, Fp)

    # (L, Cout, Cin, 3) -> (L, 3, Cin, Cout) -> pad -> (L, 3*Fp, Fp)
    wd = jnp.transpose(p['wd_pt'], (0, 3, 2, 1))
    wd = jnp.pad(wd, ((0, 0), (0, 0), (0, Fp - F), (0, Fp - F)))
    wd = wd.reshape(num_layers, 3 * Fp, Fp).astype(jnp.bfloat16)
    bd = jnp.pad(p['bd_pt'], ((0, 0), (0, Fp - F))).reshape(num_layers, 1, Fp)

    w1 = jnp.transpose(p['w1_pt'], (0, 2, 1))
    w1 = jnp.pad(w1, ((0, 0), (0, Fp - F), (0, Fp - F))).astype(jnp.bfloat16)
    b1 = jnp.pad(p['b1_pt'], ((0, 0), (0, Fp - F))).reshape(num_layers, 1, Fp)

    w_out = jnp.pad(p['w_out_pt'].T, ((0, Fp - F), (0, Cp - C))).astype(jnp.bfloat16)
    b_out = jnp.pad(p['b_out_pt'], (0, Cp - C)).reshape(1, Cp)

    return dict(w_in=w_in, b_in=b_in, wd=wd, bd=bd, w1=w1, b1=b1,
                w_out=w_out, b_out=b_out, Fp=Fp, Cp=Cp)


def sstcn_forward(x, mask, p, num_layers):
    """x: (N, dim, T), mask: (N, C_mask, T) (PyTorch NCT). Returns (N, num_classes, T)."""
    N, D, T = x.shape
    C = p['w_out_pt'].shape[0]
    kp = _prepare_params(p, num_layers)
    Fp, Cp = kp['Fp'], kp['Cp']

    # NOTE: at very large D this transpose is an extra HBM pass; kept here for
    # simplicity at these shapes (the projection kernel wants channels-last).
    x_tc = jnp.transpose(x, (0, 2, 1))                      # (N, T, D)
    m_tc = jnp.transpose(mask[:, 0:1, :], (0, 2, 1))        # (N, T, 1)

    # ---- kernel 1: input projection, tiled over time ----
    tT = _choose_time_tile(T)
    act = pl.pallas_call(
        _inproj_kernel,
        out_shape=jax.ShapeDtypeStruct((N, T, Fp), jnp.float32),
        grid=(N, T // tT),
        in_specs=[
            pl.BlockSpec((1, tT, D), lambda n, t: (n, t, 0)),
            pl.BlockSpec((D, Fp), lambda n, t: (0, 0)),
            pl.BlockSpec((1, Fp), lambda n, t: (0, 0)),
        ],
        out_specs=pl.BlockSpec((1, tT, Fp), lambda n, t: (n, t, 0)),
        compiler_params=pltpu.CompilerParams(
            dimension_semantics=("parallel", "parallel")),
    )(x_tc, kp['w_in'], kp['b_in'])

    # ---- kernel 2: dilated residual stack + output conv ----
    d_max = 2 ** (num_layers - 1)
    pad_lo = _round_up(d_max, 8)                            # aligned centre store
    Tp = pad_lo + T + d_max

    full = lambda a: pl.BlockSpec(a.shape, lambda n, _nd=a.ndim: (0,) * _nd)
    out_tc = pl.pallas_call(
        functools.partial(_stack_kernel, num_layers, pad_lo),
        out_shape=jax.ShapeDtypeStruct((N, T, Cp), jnp.float32),
        grid=(N,),
        in_specs=[
            pl.BlockSpec((1, T, Fp), lambda n: (n, 0, 0)),  # activation
            pl.BlockSpec((1, T, 1), lambda n: (n, 0, 0)),   # mask[:, 0:1, :]
            full(kp['wd']), full(kp['bd']),
            full(kp['w1']), full(kp['b1']),
            full(kp['w_out']), full(kp['b_out']),
        ],
        out_specs=pl.BlockSpec((1, T, Cp), lambda n: (n, 0, 0)),
        scratch_shapes=[pltpu.VMEM((Tp, Fp), jnp.float32)],
        compiler_params=pltpu.CompilerParams(
            dimension_semantics=("parallel",)),
    )(act, m_tc, kp['wd'], kp['bd'], kp['w1'], kp['b1'],
      kp['w_out'], kp['b_out'])

    return jnp.transpose(out_tc[..., :C], (0, 2, 1))        # (N, C, T)


def init_params(key, num_layers, num_f_maps, dim, num_classes):
    """Deterministic synthetic weights in PyTorch layout."""
    ks = jax.random.split(key, 8)
    scale = 0.1
    return dict(
        w_in_pt=scale * jax.random.normal(ks[0], (num_f_maps, dim)),
        b_in_pt=scale * jax.random.normal(ks[1], (num_f_maps,)),
        wd_pt=scale * jax.random.normal(ks[2], (num_layers, num_f_maps, num_f_maps, 3)),
        bd_pt=scale * jax.random.normal(ks[3], (num_layers, num_f_maps)),
        w1_pt=scale * jax.random.normal(ks[4], (num_layers, num_f_maps, num_f_maps)),
        b1_pt=scale * jax.random.normal(ks[5], (num_layers, num_f_maps)),
        w_out_pt=scale * jax.random.normal(ks[6], (num_classes, num_f_maps)),
        b_out_pt=scale * jax.random.normal(ks[7], (num_classes,)),
    )


def ref_forward(x, mask, p, num_layers):
    """Pure-JAX f32 reference in PyTorch NCT layout (validation only)."""
    def pw(v, w, b):  # pointwise conv, w: (Cout, Cin)
        return jnp.einsum('oc,nct->not', w, v) + b[None, :, None]

    T = x.shape[-1]
    out = pw(x, p['w_in_pt'], p['b_in_pt'])
    for l in range(num_layers):
        d = 2 ** l
        xp = jnp.pad(out, ((0, 0), (0, 0), (d, d)))
        h = sum(jnp.einsum('oc,nct->not', p['wd_pt'][l, :, :, k],
                           xp[:, :, k * d:k * d + T]) for k in range(3))
        h = h + p['bd_pt'][l][None, :, None]
        h = jax.nn.relu(h)
        h = pw(h, p['w1_pt'][l], p['b1_pt'][l])
        out = out + h
    return pw(out, p['w_out_pt'], p['b_out_pt']) * mask[:, 0:1, :]


if __name__ == "__main__":
    # Small shapes consistent with SS_TCN(num_layers=3, num_f_maps=8, dim=4, num_classes=6)
    N, D, T = 2, 4, 16
    num_layers, num_f_maps, num_classes = 3, 8, 6

    key = jax.random.PRNGKey(0)
    kx, km, kp = jax.random.split(key, 3)
    x = jax.random.normal(kx, (N, D, T), dtype=jnp.float32)
    mask = jnp.ones((N, num_classes, T), dtype=jnp.float32)
    mask = mask.at[1, :, 12:].set(0.0)                      # ragged sequence mask

    params = init_params(kp, num_layers, num_f_maps, D, num_classes)

    out = sstcn_forward(x, mask, params, num_layers)
    out = jax.block_until_ready(out)

    ref = ref_forward(x, mask, params, num_layers)
    np.testing.assert_allclose(np.asarray(out), np.asarray(ref),
                               rtol=2e-2, atol=2e-2)        # bf16 matmuls vs f32 ref
    assert out.shape == (N, num_classes, T)
    print("KERNEL_OK")
</pallas_src>

<mosaic_0001>
module attributes {stable_mosaic.version = 11 : i64} {
  func.func @_inproj_kernel(%arg0: i32, %arg1: i32, %arg2: memref<1x16x4xf32, #tpu.memory_space<vmem>>, %arg3: memref<4x128xbf16, #tpu.memory_space<vmem>>, %arg4: memref<1x128xf32, #tpu.memory_space<vmem>>, %arg5: memref<1x16x128xf32, #tpu.memory_space<vmem>>) attributes {dimension_semantics = [#tpu.dimension_semantics<parallel>, #tpu.dimension_semantics<parallel>], iteration_bounds = array<i64: 2, 1>, scalar_prefetch = 0 : i64, scratch_operands = 0 : i64, tpu.core_type = #tpu.core_type<tc>, window_params = [{transform_indices = @transform_0, window_bounds = array<i64: 1, 16, 4>}, {pipeline_mode = #tpu.pipeline_mode<synchronous>, transform_indices = @transform_1, window_bounds = array<i64: 4, 128>}, {pipeline_mode = #tpu.pipeline_mode<synchronous>, transform_indices = @transform_2, window_bounds = array<i64: 1, 128>}, {transform_indices = @transform_3, window_bounds = array<i64: 1, 16, 128>}]} {
    %c0 = arith.constant 0 : index
    %c0_0 = arith.constant 0 : index
    %c0_1 = arith.constant 0 : index
    %0 = vector.load %arg2[%c0, %c0_0, %c0_1] : memref<1x16x4xf32, #tpu.memory_space<vmem>>, vector<1x16x4xf32>
    %1 = vector.shape_cast %0 : vector<1x16x4xf32> to vector<16x4xf32>
    %2 = arith.truncf %1 : vector<16x4xf32> to vector<16x4xbf16>
    %c0_2 = arith.constant 0 : index
    %c0_3 = arith.constant 0 : index
    %3 = vector.load %arg3[%c0_2, %c0_3] : memref<4x128xbf16, #tpu.memory_space<vmem>>, vector<4x128xbf16>
    %cst = arith.constant dense<0.000000e+00> : vector<16x128xf32>
    %4 = tpu.matmul %2, %3, %cst {dimension_numbers = #tpu.dot_dimension_numbers<[1], [0], [0], [1], [0, 0, 1, 1], [], []>} : vector<16x4xbf16>, vector<4x128xbf16>, vector<16x128xf32> -> vector<16x128xf32>
    %c0_4 = arith.constant 0 : index
    %c0_5 = arith.constant 0 : index
    %5 = vector.load %arg4[%c0_4, %c0_5] : memref<1x128xf32, #tpu.memory_space<vmem>>, vector<1x128xf32>
    %6 = vector.broadcast %5 : vector<1x128xf32> to vector<16x128xf32>
    %7 = arith.addf %4, %6 : vector<16x128xf32>
    %c0_6 = arith.constant 0 : index
    %c0_7 = arith.constant 0 : index
    %c0_8 = arith.constant 0 : index
    %8 = vector.load %arg5[%c0_6, %c0_7, %c0_8] : memref<1x16x128xf32, #tpu.memory_space<vmem>>, vector<1x16x128xf32>
    %9 = vector.shape_cast %8 : vector<1x16x128xf32> to vector<16x128xf32>
    %10 = vector.shape_cast %7 : vector<16x128xf32> to vector<1x16x128xf32>
    tpu.vector_store %arg5[%c0_6, %c0_7, %c0_8], %10 {strides = array<i32>} : memref<1x16x128xf32, #tpu.memory_space<vmem>>, vector<1x16x128xf32>,
    return
  }
  func.func @transform_0(%arg0: i32, %arg1: i32) -> (i32, i32, i32) {
    %c0_i32 = arith.constant 0 : i32
    %c0_i32_0 = arith.constant 0 : i32
    return %arg0, %arg1, %c0_i32 : i32, i32, i32
  }
  func.func @transform_1(%arg0: i32, %arg1: i32) -> (i32, i32) {
    %c0_i32 = arith.constant 0 : i32
    %c0_i32_0 = arith.constant 0 : i32
    %c0_i32_1 = arith.constant 0 : i32
    return %c0_i32, %c0_i32_0 : i32, i32
  }
  func.func @transform_2(%arg0: i32, %arg1: i32) -> (i32, i32) {
    %c0_i32 = arith.constant 0 : i32
    %c0_i32_0 = arith.constant 0 : i32
    %c0_i32_1 = arith.constant 0 : i32
    return %c0_i32, %c0_i32_0 : i32, i32
  }
  func.func @transform_3(%arg0: i32, %arg1: i32) -> (i32, i32, i32) {
    %c0_i32 = arith.constant 0 : i32
    %c0_i32_0 = arith.constant 0 : i32
    return %arg0, %arg1, %c0_i32 : i32, i32, i32
  }
}

</mosaic_0001>

<bundles_post_ra>
// kernel: tpu_custom_call.1
= control target key start
LH: loop header
LB: loop body
LE: loop exit
PB: predicated region body
PF: predicated region fallthrough
CT: control target
= control target key end

     0   :  { %8 = vsyncpa [#allocation3], 0  ;;  %s665_s0 = inlined_call_operand.vmem [shape: f32[2,16,4], index: 0, kind: input, shape index: {}]   ;;  %s666_s1 = inlined_call_operand.vmem [shape: bf16[4,128], index: 1, kind: input, shape index: {}]   ;;  %s667_s2 = inlined_call_operand.vmem [shape: f32[1,128], index: 2, kind: input, shape index: {}]   ;;  %s668_s3 = inlined_call_operand.hbm [shape: f32[2,16,128], index: 3, kind: output, shape index: {}]  }
   0x1   :  { %10 = vsyncpa [#allocation3 + $0x1], 0  ;;  %s545_s12 = smov 0   ;;  %s547_s13 = smov 0  }
   0x2   :  { %s549_s14 = smov 0   ;;  %s551_s15 = smov 0  }
   0x3   :  { %s553_s16 = smov 0   ;;  %s555_s17 = smov 0  }
   0x4 LB: > { %s358_s18 = sadd.s32 4294967295, %s518_s17   ;;  %s359_s19 = sadd.s32 4294967294, %s518_s17   ;;  %s518_s17 = sphi %s555_s17, %s16_s17   ;;  %s514_s16 = sphi %s553_s16, %s675_s16   ;;  %s510_s15 = sphi %s551_s15, %s674_s15   ;;  %s506_s14 = sphi %s549_s14, %s673_s14   ;;  %s502_s13 = sphi %s547_s13, %s672_s13   ;;  %s498_s12 = sphi %s545_s12, %s671_s12  }
   0x5   : > { %s28_s20 = sadd.s32 1, %s514_s16  ;;  %s107_s21 = sadd.s32 1, %s506_s14 }
   0x6   : > { %p30_p0 = scmp.ge.s32.totalorder %s28_s20, 2  ;;  %p117_p1 = scmp.ne.s32.totalorder %s506_s14, %s502_s13 }
   0x7   : > { %p118_p2 = scmp.eq.s32.totalorder %s358_s18, 1  ;;  %p123_p3 = scmp.ne.s32.totalorder %s502_s13, %s498_s12 }
   0x8   : > { %s677_s20 = smov (%p30_p0, %s28_s20), 0  ;;  %p124_p5 = scmp.eq.s32.totalorder %s359_s19, 1 }
   0x9   : > { %p585_p4 = por %p118_p2, %p117_p1  ;;  %s102_s23 = ssub.s32 %s514_s16, %s677_s20 }
   0xa   : > { %p362_p6 = scmp.ge.s32.totalorder %s518_s17, 1  ;;  %p105_p7 = scmp.eq.s32.totalorder %s102_s23, 0 }
   0xb   : > { %p592_p8 = por %p124_p5, %p123_p3  ;;  %p161_p9 = scmp.lt.s32.totalorder %s518_s17, 3 }
   0xc   : > { %s598_s25 = scalar_select %p105_p7, %s506_s14, %s107_s21  }
   0xd   : > { %p162_p10 = pnand %p362_p6, %p161_p9 }
   0xe   : > { %p190_p11 = scmp.lt.s32.totalorder (!%p162_p10), %s510_s15, 1  ;;  %s186_s6 = sand.u32 (!%p162_p10), 1, %s502_s13  }
   0xf   : > { %165 = sbr.rel (%p162_p10) target bundleno = 240 (0xf0), region = 32  ;;  %s363_s7 = sshll.u32 (!%p162_p10), %s186_s6, 4 }
  0x10   : > { %s188_s10 = scalar_lea.vmem (!%p162_p10), [#allocation2], %s363_s7  ;;  %s374_s18 = sshll.u32 (!%p162_p10), %s510_s15, 8 }
  0x11   : > { %s279_s11 = sshll.u32 (!%p162_p10), %s188_s10, 4  ;;  %s618_s23 = scalar_lea.hbm (!%p162_p10), %s668_s3, %s374_s18  ;;  %s613_s11 = int_to_ptr.vmem [resolvable:$true] %s279_s11 }
  0x12   : > { %s620_s26 = scalar_lea.sflag (!%p162_p10), [#allocation3], %s186_s6  ;;  %s442_s27 = scalar_lea.vmem (!%p162_p10), %s613_s11, 256 }
  0x13   : > { %p443_p12 = scmp.ne.s32.totalorder (!%p162_p10), %s613_s11, %s442_s27 }
  0x14   : > { %v204_v0 = vld [vmem:[%s666_s1] sm:$0x3]  ;;  %vm216_vm0 = vcmask 1041408   ;;  %v520_v1 = vmov 0.0   ;;  %vm521_vm1 = vmmov 0   ;;  %s191_s28 = scalar_select %p190_p11, %s510_s15, 1 }
  0x15   : > { %377 = vmatprep.subr.bf16.mxu0 %v520_v1  ;;  %v218_v2 = vsel %vm216_vm0, %v204_v0, 0  ;;  %379 = vmatprep.mubr.msk.bf16.mxu0 %vm521_vm1, %v520_v1  ;;  %vm212_vm2 = vcmask 31744   ;;  %v366_v6 = vld [vmem:[%s667_s2] ss:$0 sm:$0xff]  ;;  %p444_p13 = pnand %p443_p12, %p585_p4  ;;  %s522_s15 = smov [#allocation2]  }
  0x16   : > { %378 = vmatpush3.bf16.msra.mxu0 %v218_v2  ;;  %s373_s29 = sshll.u32 %s191_s28, 4  ;;  %s446_s28 = sshll.u32 %s522_s15, 4  ;;  %s447_s28 = int_to_ptr.vmem [resolvable:$false] %s446_s28 }
  0x17   : > { %s197_s5 = scalar_lea.vmem %s665_s0, %s373_s29  ;;  %p445_p0 = pneg %p444_p13 }
  0x18   : > { %v201_v3 = vld [vmem:[%s197_s5] sm:$0xff]  ;;  %v202_v4 = vld [vmem:[%s197_s5 + $0x8] sm:$0xff]  ;;  %s448_s29 = scalar_lea.vmem %s447_s28, 512  ;;  %p449_p1 = scmp.lt.s32.totalorder %s613_s11, %s447_s28 }
  0x19   : > { %v203_v5 = vpack.c.bf16 %v202_v4, %v201_v3  ;;  %p450_p2 = scmp.lt.s32.totalorder %s448_s29, %s442_s27 }
  0x1b   : > { %380 = vmatmul.mubr.msk.bf16.vlgmr.msra.gmra.mxu0 %vm212_vm2, %v203_v5  ;;  %p451_p3 = por %p450_p2, %p449_p1 }
  0x1d   : > { %p452_p5 = pnand %p451_p3, %p445_p0 }
  0xdb   : > { %v254_v7 = vpop.f32.mrf.mxu0 }
  0xdc   : > { %v255_v8 = vadd.f32 %v366_v6, %v254_v7 }
  0xdd   : > { %v381_v9 = vpop.f32.mrf.mxu0 }
  0xde   : > { %261 = vst [vmem:[%s188_s10] sm:$0xff] %v255_v8 }
  0xdf   : > { %v257_v10 = vpop.f32.mrf.mxu0 }
  0xe0   : > { %v258_v11 = vadd.f32 %v366_v6, %v257_v10 }
  0xe1   : > { %v382_v12 = vpop.f32.mrf.mxu0 }
  0xe2   : > { %262 = vst [vmem:[%s188_s10 + $0x8] sm:$0xff] %v258_v11 }
  0xe3   : > { %455 = shalt.err (!%p452_p5)
}
  0xe4   : > { %s456_s30 = scalar_lea.hbm %s618_s23, 256  ;;  %s460_s6 = scalar_lea.hbm %s668_s3, 512 }
  0xe5   : > { %p457_p6 = scmp.ne.s32.totalorder %s618_s23, %s456_s30  ;;  %p461_p10 = scmp.lt.s32.totalorder %s618_s23, %s668_s3 }
  0xe6   : > { %p462_p11 = scmp.lt.s32.totalorder %s460_s6, %s456_s30 }
  0xe7   : > { %p458_p7 = pnand %p457_p6, %p585_p4 }
  0xe8   : > { %p463_p12 = por %p462_p11, %p461_p10 }
  0xe9   : > { %p459_p9 = pneg %p458_p7 }
  0xeb   : > { %p464_p13 = pnand %p463_p12, %p459_p9 }
  0xed   : > { %467 = shalt.err (!%p464_p13)
}
  0xee   : > { %s523_s9 = smov 128   ;;  %s524_s10 = smov 8  }
  0xef   : > { %383 = dma.vmem_to_hbm [thread:$0]  (%p585_p4), %s613_s11, 256, %s618_s23, %s620_s26, %s523_s9, %s523_s9, %s524_s10  }
  0xf0 PF: > { %p389_p0 = scmp.ge.s32.totalorder %s518_s17, 2  ;;  %s294_s18 = sand.u32 1, %s498_s12  }
  0xf1   : > { %s295_s19 = scalar_lea.sflag [#allocation3], %s294_s18 }
  0xf2   : > { %p386_p1 = pnand %p389_p0, %p592_p8 }
  0xf4   : > { %p387_p2 = pneg %p386_p1 }
  0xf6   : > { %493 = dma.done.wait (%p387_p2), %s295_s19, 256  }
  0xf7   : > { %495 = vsyncadd (%p387_p2), %s295_s19, 4294967040  ;;  %s16_s17 = sadd.s32 1, %s518_s17   ;;  %s671_s12 = smov %s502_s13 }
  0xf8   : > { %p13_p3 = scmp.ge.s32.totalorder %s16_s17, 4   ;;  %s672_s13 = smov %s506_s14 }
  0xf9   : > { %s673_s14 = smov %s598_s25  ;;  %s674_s15 = smov %s514_s16 }
  0xfa   : > { %s675_s16 = smov %s677_s20  ;;  %15 = sbr.rel (!%p13_p3) target bundleno = 4 (0x4), region = 67 }
  0xff   :  { %300 = vsyncpa [#allocation3], 1 }
 0x100   :  { %302 = vsyncpa [#allocation3 + $0x1], 1 }

</bundles_post_ra>
